<compile_context>
chip_gen: v7x
topology: tpu7x:2x2x1
jax: 0.10.0
libtpu: 0.0.40
codegen_flags: <defaults>
</compile_context>

<pallas_src>
import numpy as np
import jax
import jax.numpy as jnp
from jax.experimental import pallas as pl
from jax.experimental.pallas import tpu as pltpu


def _round_up(x, m):
    return ((x + m - 1) // m) * m


def conv_decoder_kernel(x_ref, w_ref, o_ref):
    # x_ref: [B_tile, K*N] (bf16), w_ref: [K*N, T_tile] (bf16), o_ref: [B_tile, T_tile] (f32)
    # One dense MXU matmul per tile; f32 accumulation.
    o_ref[...] = jnp.dot(x_ref[...], w_ref[...], preferred_element_type=jnp.float32)


def conv_decoder_forward(output_representation, weight, stride, *, b_tile=None, t_tile_max=512):
    """output_representation: [B, 1, N, K]; weight: [N, 1, L] (ConvTranspose1d weight).

    Returns the denoised signal [B, 1, T] with T = (K - 1) * stride + L.
    """
    # Squeeze ONLY the channel dim: jnp.squeeze() with no axis would also drop the batch
    # dim when B == 1 and break the shape unpack below.
    x3 = jnp.squeeze(output_representation, axis=1)            # [B, N, K]
    B, N, K = x3.shape
    L = weight.shape[-1]
    T = (K - 1) * stride + L

    # --- tile sizes --------------------------------------------------------------
    if b_tile is None:
        b_tile = min(128, _round_up(B, 8))                      # >= 8 sublanes per output tile
    B_pad = _round_up(B, b_tile)
    t_tile = min(t_tile_max, _round_up(T, 128))                 # lane-dense time tiles
    T_pad = _round_up(T, t_tile)

    # --- input: [B_pad, K*N] bf16, flattened so (k, n) is the contraction dim -----
    x_kn = jnp.transpose(x3, (0, 2, 1)).reshape(B, K * N)       # element [b, k*N + n] = x3[b, n, k]
    if B_pad != B:
        x_kn = jnp.pad(x_kn, ((0, B_pad - B), (0, 0)))
    x_kn = x_kn.astype(jnp.bfloat16)

    # --- effective weight: Weff[k*N + n, t] = w[n, t - k*stride] (zero elsewhere) --
    # Placement indices are static (NumPy, built once per shape); only the values come
    # from `weight`.  Zeros are exact in bf16, so only the x*w products see bf16 rounding.
    w2 = weight[:, 0, :]                                        # [N, L]
    rows = np.arange(K * N)
    n_of = rows % N
    k_of = rows // N
    cols = k_of[:, None] * stride + np.arange(L)[None, :]       # [K*N, L], all < T <= T_pad
    weff = jnp.zeros((K * N, T_pad), jnp.float32)
    weff = weff.at[rows[:, None], cols].set(w2[n_of, :])
    weff = weff.astype(jnp.bfloat16)
    # TODO(synk): for very large K/T, select only the ~L/stride frames that overlap each
    # time tile (banded effective weight via scalar-prefetched index_maps) instead of
    # materializing the full [K*N, T_pad] matrix.

    grid = (B_pad // b_tile, T_pad // t_tile)                   # batch tiles lead (megacore)

    out = pl.pallas_call(
        conv_decoder_kernel,
        out_shape=jax.ShapeDtypeStruct((B_pad, T_pad), jnp.float32),
        grid=grid,
        in_specs=[
            pl.BlockSpec((b_tile, K * N), lambda i, j: (i, 0)),   # x: invariant over time tiles
            pl.BlockSpec((K * N, t_tile), lambda i, j: (0, j)),   # Weff: invariant over batch tiles
        ],
        out_specs=pl.BlockSpec((b_tile, t_tile), lambda i, j: (i, j)),
        compiler_params=pltpu.CompilerParams(
            dimension_semantics=("parallel", "parallel"),
            vmem_limit_bytes=48 * 1024 * 1024,
        ),
    )(x_kn, weff)

    return out[:B, :T].reshape(B, 1, T)


if __name__ == "__main__":
    # Small, ConvDecoder-consistent shapes.
    B, N, K = 2, 16, 8
    L, stride = 8, 4
    T = (K - 1) * stride + L  # 36

    key = jax.random.PRNGKey(0)
    kx, kw = jax.random.split(key)
    x = jax.random.normal(kx, (B, 1, N, K), dtype=jnp.float32)
    # Deterministic weight init (shape matches nn.ConvTranspose1d(N, 1, L).weight).
    weight = jax.random.normal(kw, (N, 1, L), dtype=jnp.float32) / jnp.sqrt(N * L)

    out = conv_decoder_forward(x, weight, stride)
    out = jax.block_until_ready(out)
    assert out.shape == (B, 1, T), out.shape

    # Pure-NumPy reference of ConvTranspose1d (bias=False).  Inputs are pre-rounded to
    # bf16 (matching the kernel's operand cast); accumulation in f64.
    x_bf = np.asarray(x.astype(jnp.bfloat16).astype(jnp.float32))
    w_bf = np.asarray(weight.astype(jnp.bfloat16).astype(jnp.float32))
    x3 = x_bf[:, 0, :, :]  # [B, N, K]
    ref = np.zeros((B, 1, T), dtype=np.float64)
    for b in range(B):
        for n in range(N):
            for k in range(K):
                for l in range(L):
                    ref[b, 0, k * stride + l] += x3[b, n, k] * w_bf[n, 0, l]

    np.testing.assert_allclose(np.asarray(out), ref, rtol=1e-3, atol=1e-4)
    print("KERNEL_OK")
</pallas_src>

<mosaic_0001>
module attributes {stable_mosaic.version = 11 : i64} {
  func.func @conv_decoder_kernel(%arg0: i32, %arg1: i32, %arg2: memref<8x128xbf16, #tpu.memory_space<vmem>>, %arg3: memref<128x128xbf16, #tpu.memory_space<vmem>>, %arg4: memref<8x128xf32, #tpu.memory_space<vmem>>) attributes {dimension_semantics = [#tpu.dimension_semantics<parallel>, #tpu.dimension_semantics<parallel>], iteration_bounds = array<i64: 1, 1>, scalar_prefetch = 0 : i64, scratch_operands = 0 : i64, tpu.core_type = #tpu.core_type<tc>, window_params = [{transform_indices = @transform_0, window_bounds = array<i64: 8, 128>}, {transform_indices = @transform_1, window_bounds = array<i64: 128, 128>}, {transform_indices = @transform_2, window_bounds = array<i64: 8, 128>}]} {
    %c0 = arith.constant 0 : index
    %c0_0 = arith.constant 0 : index
    %0 = vector.load %arg2[%c0, %c0_0] : memref<8x128xbf16, #tpu.memory_space<vmem>>, vector<8x128xbf16>
    %c0_1 = arith.constant 0 : index
    %c0_2 = arith.constant 0 : index
    %1 = vector.load %arg3[%c0_1, %c0_2] : memref<128x128xbf16, #tpu.memory_space<vmem>>, vector<128x128xbf16>
    %cst = arith.constant dense<0.000000e+00> : vector<8x128xf32>
    %2 = tpu.matmul %0, %1, %cst {dimension_numbers = #tpu.dot_dimension_numbers<[1], [0], [0], [1], [0, 0, 1, 1], [], []>} : vector<8x128xbf16>, vector<128x128xbf16>, vector<8x128xf32> -> vector<8x128xf32>
    %c0_3 = arith.constant 0 : index
    %c0_4 = arith.constant 0 : index
    %3 = vector.load %arg4[%c0_3, %c0_4] : memref<8x128xf32, #tpu.memory_space<vmem>>, vector<8x128xf32>
    tpu.vector_store %arg4[%c0_3, %c0_4], %2 {strides = array<i32>} : memref<8x128xf32, #tpu.memory_space<vmem>>, vector<8x128xf32>,
    return
  }
  func.func @transform_0(%arg0: i32, %arg1: i32) -> (i32, i32) {
    %c0_i32 = arith.constant 0 : i32
    %c0_i32_0 = arith.constant 0 : i32
    return %arg0, %c0_i32 : i32, i32
  }
  func.func @transform_1(%arg0: i32, %arg1: i32) -> (i32, i32) {
    %c0_i32 = arith.constant 0 : i32
    %c0_i32_0 = arith.constant 0 : i32
    return %c0_i32, %arg1 : i32, i32
  }
  func.func @transform_2(%arg0: i32, %arg1: i32) -> (i32, i32) {
    %c0_i32 = arith.constant 0 : i32
    return %arg0, %arg1 : i32, i32
  }
}

</mosaic_0001>

<bundles_post_ra>
// kernel: tpu_custom_call.1
= control target key start
LH: loop header
LB: loop body
LE: loop exit
PB: predicated region body
PF: predicated region fallthrough
CT: control target
= control target key end

     0   :  { %7 = vsyncpa [#allocation3], 0  ;;  %s350_s0 = inlined_call_operand.hbm [shape: bf16[8,128], index: 0, kind: input, shape index: {}]   ;;  %s351_s1 = inlined_call_operand.hbm [shape: bf16[128,128], index: 1, kind: input, shape index: {}]   ;;  %s352_s2 = inlined_call_operand.hbm [shape: f32[8,128], index: 2, kind: output, shape index: {}]  }
   0x1   :  { %8 = vsyncpa [#allocation6], 0 }
   0x2   :  { %9 = vsyncpa [#allocation4], 0  ;;  %s285_s9 = smov [#allocation2]   ;;  %s286_s11 = smov [#allocation5]  }
   0x3   :  { %s16_s10 = sshll.u32 %s285_s9, 4  ;;  %s25_s12 = sshll.u32 %s286_s11, 4  ;;  %s17_s10 = int_to_ptr.vmem [resolvable:$true] %s16_s10  ;;  %s307_s12 = int_to_ptr.vmem [resolvable:$true] %s25_s12 }
   0x4   :  { %s213_s15 = scalar_lea.hbm %s350_s0, 64 }
   0x5   :  { %p214_p0 = scmp.ne.s32.totalorder %s350_s0, %s213_s15  ;;  %p217_p1 = scmp.lt.u32.totalorder %s213_s15, %s350_s0 }
   0x7   :  { %p219_p2 = pnand %p217_p1, %p214_p0 }
   0x9   :  { %222 = shalt.err (!%p219_p2)
}
   0xa   :  { %s223_s20 = scalar_lea.vmem %s17_s10, 64  ;;  %p228_p4 = scmp.lt.s32.totalorder %s17_s10, %s17_s10 }
   0xb   :  { %p224_p3 = scmp.ne.s32.totalorder %s17_s10, %s223_s20  ;;  %p229_p5 = scmp.lt.s32.totalorder %s223_s20, %s223_s20 }
   0xd   :  { %p230_p6 = por %p229_p5, %p228_p4 }
   0xf   :  { %p231_p7 = pnand %p230_p6, %p224_p3 }
  0x11   :  { %234 = shalt.err (!%p231_p7)
}
  0x12   :  { %19 = dma.hbm_to_vmem [thread:$0]  %s350_s0, 64, %s17_s10, [#allocation3]  }
  0x13   :  { %s235_s25 = scalar_lea.hbm %s351_s1, 1024 }
  0x14   :  { %p236_p8 = scmp.ne.s32.totalorder %s351_s1, %s235_s25  ;;  %p239_p9 = scmp.lt.u32.totalorder %s235_s25, %s351_s1 }
  0x16   :  { %p241_p10 = pnand %p239_p9, %p236_p8 }
  0x18   :  { %244 = shalt.err (!%p241_p10)
}
  0x19   :  { %s245_s30 = scalar_lea.vmem %s307_s12, 1024  ;;  %p250_p12 = scmp.lt.s32.totalorder %s307_s12, %s307_s12 }
  0x1a   :  { %p246_p11 = scmp.ne.s32.totalorder %s307_s12, %s245_s30  ;;  %p251_p13 = scmp.lt.s32.totalorder %s245_s30, %s245_s30 }
  0x1c   :  { %p252_p0 = por %p251_p13, %p250_p12 }
  0x1e   :  { %p253_p1 = pnand %p252_p0, %p246_p11 }
  0x20   :  { %256 = shalt.err (!%p253_p1)
}
  0x21   :  { %s287_s0 = smov 64   ;;  %s288_s3 = smov 4  }
  0x22   :  { %31 = dma.hbm_to_vmem [thread:$0]  %s351_s1, 1024, %s307_s12, [#allocation6], %s287_s0, %s287_s0, %s288_s3  }
  0x23   :  { %279 = dma.done.wait [#allocation3], 64  }
  0x24   :  { %280 = vsyncadd [#allocation3], 4294967232 }
  0x25   :  { %281 = dma.done.wait [#allocation6], 1024  }
  0x26   :  { %282 = vsyncadd [#allocation6], 4294966272  ;;  %v289_v0 = vmov 0.0   ;;  %vm290_vm0 = vmmov 0   ;;  %v205_v1 = vld [vmem:[#allocation5] sm:$0xff]   ;;  %v206_v2 = vld [vmem:[#allocation5 + $0x8] sm:$0xff]  }
  0x27   :  { %178 = vmatprep.subr.bf16.mxu0 %v289_v0  ;;  %194 = vmatprep.mubr.msk.bf16.mxu0 %vm290_vm0, %v289_v0  ;;  %v207_v3 = vld [vmem:[#allocation5 + $0x10] sm:$0xff]   ;;  %v208_v4 = vld [vmem:[#allocation5 + $0x18] sm:$0xff]   ;;  %v209_v5 = vld [vmem:[#allocation5 + $0x20] sm:$0xff]   ;;  %s291_s1 = smov [#allocation7]  }
  0x28   :  { %179 = vmatpush3.bf16.msra.mxu0 %v205_v1  ;;  %v210_v6 = vld [vmem:[#allocation5 + $0x28] sm:$0xff]   ;;  %v211_v7 = vld [vmem:[#allocation5 + $0x30] sm:$0xff]   ;;  %v212_v8 = vld [vmem:[#allocation5 + $0x38] sm:$0xff]   ;;  %s151_s6 = sshll.u32 %s291_s1, 4  ;;  %s152_s6 = int_to_ptr.vmem [resolvable:$true] %s151_s6 }
  0x29   :  { %180 = vmatprep.subr.bf16.mxu0 %v289_v0  ;;  %v39_v9 = vld [vmem:[#allocation2] sm:$0xf]  ;;  %s257_s7 = scalar_lea.vmem %s152_s6, 128  ;;  %p262_p3 = scmp.lt.s32.totalorder %s152_s6, %s152_s6 }
  0x2a   :  { %p258_p2 = scmp.ne.s32.totalorder %s152_s6, %s257_s7  ;;  %p263_p4 = scmp.lt.s32.totalorder %s257_s7, %s257_s7 }
  0x2c   :  { %181 = vmatpush3.bf16.msra.mxu0 %v206_v2  ;;  %p264_p5 = por %p263_p4, %p262_p3 }
  0x2d   :  { %182 = vmatprep.subr.bf16.mxu0 %v289_v0 }
  0x2e   :  { %p265_p6 = pnand %p264_p5, %p258_p2 }
  0x30   :  { %183 = vmatpush3.bf16.msra.mxu0 %v207_v3 }
  0x31   :  { %184 = vmatprep.subr.bf16.mxu0 %v289_v0 }
  0x34   :  { %185 = vmatpush3.bf16.msra.mxu0 %v208_v4 }
  0x35   :  { %186 = vmatprep.subr.bf16.mxu0 %v289_v0 }
  0x38   :  { %187 = vmatpush3.bf16.msra.mxu0 %v209_v5 }
  0x39   :  { %188 = vmatprep.subr.bf16.mxu0 %v289_v0 }
  0x3c   :  { %189 = vmatpush3.bf16.msra.mxu0 %v210_v6 }
  0x3d   :  { %190 = vmatprep.subr.bf16.mxu0 %v289_v0 }
  0x40   :  { %191 = vmatpush3.bf16.msra.mxu0 %v211_v7 }
  0x41   :  { %192 = vmatprep.subr.bf16.mxu0 %v289_v0 }
  0x44   :  { %193 = vmatpush3.bf16.msra.mxu0 %v212_v8 }
  0x47   :  { %195 = vmatmul.mubr.bf16.vlgmr.msra.gmra.mrb[0].mxu0 %v39_v9 }
 0x11a   :  { %v138_v10 = vpop.f32.mrb[0].mxu0 }
 0x11b   :  { %144 = vst [vmem:[#allocation7] sm:$0xff] %v138_v10  ;;  %v196_v11 = vpop.f32.mrb[1].mxu0 }
 0x11c   :  { %v141_v12 = vpop.f32.mrb[2].mxu0 }
 0x11d   :  { %268 = shalt.err (!%p265_p6)
}
 0x11e   :  { %s269_s10 = scalar_lea.hbm %s352_s2, 128 }
 0x11f   :  { %p270_p7 = scmp.ne.s32.totalorder %s352_s2, %s269_s10  ;;  %p273_p8 = scmp.lt.u32.totalorder %s269_s10, %s352_s2 }
 0x121   :  { %p275_p9 = pnand %p273_p8, %p270_p7 }
 0x123   :  { %278 = shalt.err (!%p275_p9)
}
 0x124   :  { %154 = dma.vmem_to_hbm [thread:$0]  %s152_s6, 128, %s352_s2, [#allocation4]   ;;  %v197_v13 = vpop.f32.mrb[3].mxu0 }
 0x125   :  { %283 = dma.done.wait [#allocation4], 128  }
 0x126   :  { %284 = vsyncadd [#allocation4], 4294967168 }
 0x127   :  { %158 = vsyncpa [#allocation3], 1 }
 0x128   :  { %159 = vsyncpa [#allocation6], 1 }
 0x129   :  { %160 = vsyncpa [#allocation4], 1 }

</bundles_post_ra>
